<compile_context>
chip_gen: v7x
topology: tpu7x:2x2x1
jax: 0.10.0
libtpu: 0.0.40
codegen_flags: <defaults>
</compile_context>

<pallas_src>
import functools

import jax
import jax.numpy as jnp
from jax.experimental import pallas as pl
from jax.experimental.pallas import tpu as pltpu


def _round_up(x, m):
    return ((x + m - 1) // m) * m


def _mlp_kernel(x_ref, w_ref, b_ref, o_ref, *, inp, inp_pad, width):
    # One grid step = one tile of batch rows.  The weight / bias block indices are
    # constant across the grid, so both slabs are DMA'd once and stay resident in VMEM.
    x = x_ref[...].astype(jnp.bfloat16)                 # [bt, inp]
    w1 = w_ref[0:inp, :]                                # [inp, W]   bf16
    w2 = w_ref[inp_pad:inp_pad + width, :]              # [W,   W]   bf16
    b1 = b_ref[0:1, :]                                  # [1,   W]   f32
    b2 = b_ref[1:2, :]                                  # [1,   W]   f32

    # fc1: bf16 MXU matmul, f32 accumulation, f32 bias add
    h = jnp.dot(x, w1, preferred_element_type=jnp.float32) + b1
    # LeakyReLU(0.2) in f32 on the VPU
    h = jnp.where(h > 0, h, 0.2 * h)
    # TODO(synk): training-mode dropout (pltpu.prng_random_bits mask) not emitted;
    # nn.Dropout is identity in eval/inference mode, which is what is implemented.

    # fc2 + bias, sigmoid (EUP exp path), lane-dense full-width store
    y = jnp.dot(h.astype(jnp.bfloat16), w2, preferred_element_type=jnp.float32) + b2
    o_ref[...] = jax.nn.sigmoid(y).astype(o_ref.dtype)


def pack_params(w1, b1, w2, b2):
    """Pack fc1/fc2 weights into one lane-dense bf16 slab and biases into a small f32 slab.

    w1: [inp, h1] (transposed from torch's [h1, inp]), b1: [h1]
    w2: [h1, out] (transposed from torch's [out, h1]), b2: [out]
    """
    inp, h1 = w1.shape
    h1_2, out = w2.shape
    assert h1_2 == h1 and b1.shape == (h1,) and b2.shape == (out,)

    width = max(_round_up(h1, 128), _round_up(out, 128))   # lane-dense hidden & output
    inp_pad = _round_up(inp, 16)                            # bf16 sublanes pack in pairs
    rows_w = inp_pad + width                                # multiple of 16

    wslab = jnp.zeros((rows_w, width), jnp.bfloat16)
    wslab = wslab.at[0:inp, 0:h1].set(w1.astype(jnp.bfloat16))
    wslab = wslab.at[inp_pad:inp_pad + h1, 0:out].set(w2.astype(jnp.bfloat16))

    bslab = jnp.zeros((8, width), jnp.float32)              # sublane-aligned f32 tile
    bslab = bslab.at[0, 0:h1].set(b1.astype(jnp.float32))
    bslab = bslab.at[1, 0:out].set(b2.astype(jnp.float32))

    meta = dict(inp=inp, h1=h1, out=out, width=width, inp_pad=inp_pad, rows_w=rows_w)
    return wslab, bslab, meta


def model_1hl_sigmoid_forward(x, wslab, bslab, meta, *, b_tile=256):
    B, inp = x.shape
    assert inp == meta["inp"]
    width, rows_w = meta["width"], meta["rows_w"]

    # Row tile: multiple of 8, at most b_tile; don't over-pad tiny batches.
    bt = _round_up(min(b_tile, _round_up(B, 8)), 8)
    Bp = _round_up(B, bt)
    if Bp != B:
        x = jnp.pad(x, ((0, Bp - B), (0, 0)))

    kernel = functools.partial(
        _mlp_kernel, inp=inp, inp_pad=meta["inp_pad"], width=width)

    y = pl.pallas_call(
        kernel,
        out_shape=jax.ShapeDtypeStruct((Bp, width), jnp.float32),
        grid=(Bp // bt,),
        in_specs=[
            pl.BlockSpec((bt, inp), lambda i: (i, 0)),        # batch tile of rows
            pl.BlockSpec((rows_w, width), lambda i: (0, 0)),  # packed bf16 weights, resident
            pl.BlockSpec((8, width), lambda i: (0, 0)),       # f32 biases, resident
        ],
        out_specs=pl.BlockSpec((bt, width), lambda i: (i, 0)),
        compiler_params=pltpu.CompilerParams(
            dimension_semantics=("parallel",)),
    )(x, wslab, bslab)

    return y[:B, :meta["out"]]


if __name__ == "__main__":
    # Small shapes consistent with the module: inp=32, h1=64, out=16, batch=8
    B, INP, H1, OUT = 8, 32, 64, 16
    DR = 0.1  # dropout rate (identity in eval mode)

    key = jax.random.PRNGKey(0)
    kx, kw1, kw2, kb1, kb2 = jax.random.split(key, 5)

    x = jax.random.normal(kx, (B, INP), dtype=jnp.float32)

    # kaiming_normal_ default (fan_in, leaky_relu a=0 -> gain sqrt(2)); torch weight layouts.
    w1_t = jax.random.normal(kw1, (H1, INP), jnp.float32) * (2.0 / INP) ** 0.5   # [h1, inp]
    w2_t = jax.random.normal(kw2, (OUT, H1), jnp.float32) * (2.0 / H1) ** 0.5    # [out, h1]
    # Biases keep the nn.Linear default U(-1/sqrt(fan_in), 1/sqrt(fan_in)) init.
    b1 = jax.random.uniform(kb1, (H1,), jnp.float32,
                            minval=-1.0 / INP ** 0.5, maxval=1.0 / INP ** 0.5)
    b2 = jax.random.uniform(kb2, (OUT,), jnp.float32,
                            minval=-1.0 / H1 ** 0.5, maxval=1.0 / H1 ** 0.5)

    w1 = w1_t.T   # [inp, h1]
    w2 = w2_t.T   # [h1, out]

    wslab, bslab, meta = pack_params(w1, b1, w2, b2)   # pack once; reuse across calls
    y = model_1hl_sigmoid_forward(x, wslab, bslab, meta)
    y = jax.block_until_ready(y)

    # Pure-JAX reference with matching bf16 matmul operands / f32 accumulation.
    xb, w1b, w2b = (x.astype(jnp.bfloat16), w1.astype(jnp.bfloat16), w2.astype(jnp.bfloat16))
    h_ref = jnp.dot(xb, w1b, preferred_element_type=jnp.float32) + b1[None, :]
    h_ref = jnp.where(h_ref > 0, h_ref, 0.2 * h_ref)
    ref = jax.nn.sigmoid(
        jnp.dot(h_ref.astype(jnp.bfloat16), w2b, preferred_element_type=jnp.float32)
        + b2[None, :])

    assert y.shape == (B, OUT)
    assert jnp.allclose(y, ref, atol=1e-4, rtol=1e-4), float(jnp.max(jnp.abs(y - ref)))

    print("KERNEL_OK")
</pallas_src>

<mosaic_0001>
module attributes {stable_mosaic.version = 11 : i64} {
  func.func @_mlp_kernel(%arg0: i32, %arg1: memref<8x32xf32, #tpu.memory_space<vmem>>, %arg2: memref<160x128xbf16, #tpu.memory_space<vmem>>, %arg3: memref<8x128xf32, #tpu.memory_space<vmem>>, %arg4: memref<8x128xf32, #tpu.memory_space<vmem>>) attributes {dimension_semantics = [#tpu.dimension_semantics<parallel>], iteration_bounds = array<i64: 1>, scalar_prefetch = 0 : i64, scratch_operands = 0 : i64, tpu.core_type = #tpu.core_type<tc>, window_params = [{transform_indices = @transform_0, window_bounds = array<i64: 8, 32>}, {pipeline_mode = #tpu.pipeline_mode<synchronous>, transform_indices = @transform_1, window_bounds = array<i64: 160, 128>}, {pipeline_mode = #tpu.pipeline_mode<synchronous>, transform_indices = @transform_2, window_bounds = array<i64: 8, 128>}, {transform_indices = @transform_3, window_bounds = array<i64: 8, 128>}]} {
    %c0 = arith.constant 0 : index
    %c0_0 = arith.constant 0 : index
    %0 = vector.load %arg1[%c0, %c0_0] : memref<8x32xf32, #tpu.memory_space<vmem>>, vector<8x32xf32>
    %1 = arith.truncf %0 : vector<8x32xf32> to vector<8x32xbf16>
    %c0_1 = arith.constant 0 : index
    %c0_2 = arith.constant 0 : index
    %2 = vector.load %arg2[%c0_1, %c0_2] : memref<160x128xbf16, #tpu.memory_space<vmem>>, vector<32x128xbf16>
    %c32 = arith.constant 32 : index
    %c0_3 = arith.constant 0 : index
    %3 = vector.load %arg2[%c32, %c0_3] : memref<160x128xbf16, #tpu.memory_space<vmem>>, vector<128x128xbf16>
    %c0_4 = arith.constant 0 : index
    %c0_5 = arith.constant 0 : index
    %4 = vector.load %arg3[%c0_4, %c0_5] : memref<8x128xf32, #tpu.memory_space<vmem>>, vector<1x128xf32>
    %c1 = arith.constant 1 : index
    %c0_6 = arith.constant 0 : index
    %5 = vector.load %arg3[%c1, %c0_6] : memref<8x128xf32, #tpu.memory_space<vmem>>, vector<1x128xf32>
    %cst = arith.constant dense<0.000000e+00> : vector<8x128xf32>
    %6 = tpu.matmul %1, %2, %cst {dimension_numbers = #tpu.dot_dimension_numbers<[1], [0], [0], [1], [0, 0, 1, 1], [], []>} : vector<8x32xbf16>, vector<32x128xbf16>, vector<8x128xf32> -> vector<8x128xf32>
    %7 = vector.broadcast %4 : vector<1x128xf32> to vector<8x128xf32>
    %8 = arith.addf %6, %7 : vector<8x128xf32>
    %cst_7 = arith.constant 0.000000e+00 : f32
    %9 = vector.broadcast %cst_7 : f32 to vector<8x128xf32>
    %10 = arith.cmpf ogt, %8, %9 : vector<8x128xf32>
    %cst_8 = arith.constant 2.000000e-01 : f32
    %11 = vector.broadcast %cst_8 : f32 to vector<8x128xf32>
    %12 = arith.mulf %11, %8 : vector<8x128xf32>
    %13 = arith.select %10, %8, %12 : vector<8x128xi1>, vector<8x128xf32>
    %14 = arith.truncf %13 : vector<8x128xf32> to vector<8x128xbf16>
    %cst_9 = arith.constant dense<0.000000e+00> : vector<8x128xf32>
    %15 = tpu.matmul %14, %3, %cst_9 {dimension_numbers = #tpu.dot_dimension_numbers<[1], [0], [0], [1], [0, 0, 1, 1], [], []>} : vector<8x128xbf16>, vector<128x128xbf16>, vector<8x128xf32> -> vector<8x128xf32>
    %16 = vector.broadcast %5 : vector<1x128xf32> to vector<8x128xf32>
    %17 = arith.addf %15, %16 : vector<8x128xf32>
    %18 = arith.negf %17 : vector<8x128xf32>
    %19 = math.exp %18 : vector<8x128xf32>
    %cst_10 = arith.constant 1.000000e+00 : f32
    %20 = vector.broadcast %cst_10 : f32 to vector<8x128xf32>
    %21 = arith.addf %20, %19 : vector<8x128xf32>
    %22 = arith.divf %20, %21 : vector<8x128xf32>
    %c0_11 = arith.constant 0 : index
    %c0_12 = arith.constant 0 : index
    %23 = vector.load %arg4[%c0_11, %c0_12] : memref<8x128xf32, #tpu.memory_space<vmem>>, vector<8x128xf32>
    tpu.vector_store %arg4[%c0_11, %c0_12], %22 {strides = array<i32>} : memref<8x128xf32, #tpu.memory_space<vmem>>, vector<8x128xf32>,
    return
  }
  func.func @transform_0(%arg0: i32) -> (i32, i32) {
    %c0_i32 = arith.constant 0 : i32
    %c0_i32_0 = arith.constant 0 : i32
    return %arg0, %c0_i32 : i32, i32
  }
  func.func @transform_1(%arg0: i32) -> (i32, i32) {
    %c0_i32 = arith.constant 0 : i32
    %c0_i32_0 = arith.constant 0 : i32
    %c0_i32_1 = arith.constant 0 : i32
    return %c0_i32, %c0_i32_0 : i32, i32
  }
  func.func @transform_2(%arg0: i32) -> (i32, i32) {
    %c0_i32 = arith.constant 0 : i32
    %c0_i32_0 = arith.constant 0 : i32
    %c0_i32_1 = arith.constant 0 : i32
    return %c0_i32, %c0_i32_0 : i32, i32
  }
  func.func @transform_3(%arg0: i32) -> (i32, i32) {
    %c0_i32 = arith.constant 0 : i32
    %c0_i32_0 = arith.constant 0 : i32
    return %arg0, %c0_i32 : i32, i32
  }
}

</mosaic_0001>

<bundles_post_ra>
// kernel: tpu_custom_call.1
= control target key start
LH: loop header
LB: loop body
LE: loop exit
PB: predicated region body
PF: predicated region fallthrough
CT: control target
= control target key end

     0   :  { %8 = vsyncpa [#allocation3], 0  ;;  %s502_s0 = inlined_call_operand.hbm [shape: f32[8,32], index: 0, kind: input, shape index: {}]   ;;  %s503_s1 = inlined_call_operand.hbm [shape: bf16[160,128], index: 1, kind: input, shape index: {}]   ;;  %s504_s2 = inlined_call_operand.hbm [shape: f32[8,128], index: 2, kind: input, shape index: {}]   ;;  %s505_s3 = inlined_call_operand.hbm [shape: f32[8,128], index: 3, kind: output, shape index: {}]  }
   0x1   :  { %9 = vsyncpa [#allocation6], 0 }
   0x2   :  { %10 = vsyncpa [#allocation4], 0  ;;  %s426_s12 = smov [#allocation5]   ;;  %s332_s16 = scalar_lea.hbm %s503_s1, 1280 }
   0x3   :  { %s26_s13 = sshll.u32 %s426_s12, 4  ;;  %p333_p0 = scmp.ne.s32.totalorder %s503_s1, %s332_s16  ;;  %s27_s13 = int_to_ptr.vmem [resolvable:$true] %s26_s13 }
   0x4   :  { %p336_p1 = scmp.lt.u32.totalorder %s332_s16, %s503_s1 }
   0x6   :  { %p338_p2 = pnand %p336_p1, %p333_p0 }
   0x8   :  { %341 = shalt.err (!%p338_p2)
}
   0x9   :  { %s342_s21 = scalar_lea.vmem %s27_s13, 1280  ;;  %p347_p4 = scmp.lt.s32.totalorder %s27_s13, %s27_s13 }
   0xa   :  { %p343_p3 = scmp.ne.s32.totalorder %s27_s13, %s342_s21  ;;  %p348_p5 = scmp.lt.s32.totalorder %s342_s21, %s342_s21 }
   0xc   :  { %p349_p6 = por %p348_p5, %p347_p4 }
   0xe   :  { %p350_p7 = pnand %p349_p6, %p343_p3 }
  0x10   :  { %353 = shalt.err (!%p350_p7)
}
  0x11   :  { %s427_s22 = smov 64   ;;  %s428_s23 = smov 4  }
  0x12   :  { %32 = dma.hbm_to_vmem [thread:$0]  %s503_s1, 1280, %s27_s13, [#allocation6], %s427_s22, %s427_s22, %s428_s23  }
  0x13   :  { %s429_s26 = smov [#allocation2]   ;;  %s430_s28 = smov [#allocation7]  }
  0x14   :  { %s17_s27 = sshll.u32 %s429_s26, 4  ;;  %s39_s29 = sshll.u32 %s430_s28, 4  ;;  %s18_s27 = int_to_ptr.vmem [resolvable:$true] %s17_s27  ;;  %s40_s29 = int_to_ptr.vmem [resolvable:$true] %s39_s29 }
  0x15   :  { %s354_s5 = scalar_lea.hbm %s502_s0, 128 }
  0x16   :  { %p355_p8 = scmp.ne.s32.totalorder %s502_s0, %s354_s5  ;;  %p358_p9 = scmp.lt.u32.totalorder %s354_s5, %s502_s0 }
  0x18   :  { %p360_p10 = pnand %p358_p9, %p355_p8 }
  0x1a   :  { %363 = shalt.err (!%p360_p10)
}
  0x1b   :  { %s364_s1 = scalar_lea.vmem %s18_s27, 128  ;;  %p369_p12 = scmp.lt.s32.totalorder %s18_s27, %s18_s27 }
  0x1c   :  { %p365_p11 = scmp.ne.s32.totalorder %s18_s27, %s364_s1  ;;  %p370_p13 = scmp.lt.s32.totalorder %s364_s1, %s364_s1 }
  0x1e   :  { %p371_p0 = por %p370_p13, %p369_p12 }
  0x20   :  { %p372_p1 = pnand %p371_p0, %p365_p11 }
  0x22   :  { %375 = shalt.err (!%p372_p1)
}
  0x23   :  { %20 = dma.hbm_to_vmem [thread:$0]  %s502_s0, 128, %s18_s27, [#allocation3]  }
  0x24   :  { %s376_s14 = scalar_lea.hbm %s504_s2, 128 }
  0x25   :  { %p377_p2 = scmp.ne.s32.totalorder %s504_s2, %s376_s14  ;;  %p380_p3 = scmp.lt.u32.totalorder %s376_s14, %s504_s2 }
  0x27   :  { %p382_p4 = pnand %p380_p3, %p377_p2 }
  0x29   :  { %385 = shalt.err (!%p382_p4)
}
  0x2a   :  { %s386_s19 = scalar_lea.vmem %s40_s29, 128  ;;  %p391_p6 = scmp.lt.s32.totalorder %s40_s29, %s40_s29 }
  0x2b   :  { %p387_p5 = scmp.ne.s32.totalorder %s40_s29, %s386_s19  ;;  %p392_p7 = scmp.lt.s32.totalorder %s386_s19, %s386_s19 }
  0x2d   :  { %p393_p8 = por %p392_p7, %p391_p6 }
  0x2f   :  { %p394_p9 = pnand %p393_p8, %p387_p5 }
  0x31   :  { %397 = shalt.err (!%p394_p9)
}
  0x32   :  { %42 = dma.hbm_to_vmem [thread:$0]  %s504_s2, 128, %s40_s29, [#allocation6]  }
  0x33   :  { %420 = dma.done.wait [#allocation3], 128  }
  0x34   :  { %421 = vsyncadd [#allocation3], 4294967168 }
  0x35   :  { %422 = dma.done.wait [#allocation6], 1408  }
  0x36   :  { %423 = vsyncadd [#allocation6], 4294965888  ;;  %v431_v0 = vmov 0.0   ;;  %vm432_vm0 = vmmov 0   ;;  %v318_v1 = vld [vmem:[#allocation5] sm:$0xff]   ;;  %v319_v2 = vld [vmem:[#allocation5 + $0x8] sm:$0xff]  }
  0x37   :  { %282 = vmatprep.subr.bf16.mxu0 %v431_v0  ;;  %286 = vmatprep.mubr.msk.bf16.mxu0 %vm432_vm0, %v431_v0  ;;  %v53_v3 = vld [vmem:[#allocation2] sm:$0xff]  ;;  %v320_v4 = vld [vmem:[#allocation5 + $0x10] sm:$0xff]   ;;  %vm93_vm1 = vcmask 261120   ;;  %v322_v7 = vld [vmem:[#allocation5 + $0x20] sm:$0xff]   ;;  %s433_s2 = smov [#allocation8]  }
  0x38   :  { %290 = vmatprep.subr.bf16.mxu1 %v431_v0  ;;  %306 = vmatprep.mubr.msk.bf16.mxu1 %vm432_vm0, %v431_v0  ;;  %v54_v5 = vpack.c.bf16 %v53_v3, %v53_v3  ;;  %v321_v6 = vld [vmem:[#allocation5 + $0x18] sm:$0xff]   ;;  %v323_v8 = vld [vmem:[#allocation5 + $0x28] sm:$0xff]   ;;  %v324_v9 = vld [vmem:[#allocation5 + $0x30] sm:$0xff]   ;;  %s246_s21 = sshll.u32 %s433_s2, 4  ;;  %s247_s21 = int_to_ptr.vmem [resolvable:$true] %s246_s21 }
  0x39   :  { %283 = vmatpush3.bf16.msra.mxu0 %v318_v1  ;;  %291 = vmatpush3.bf16.msra.mxu1 %v320_v4  ;;  %v325_v10 = vld [vmem:[#allocation5 + $0x38] sm:$0xff]   ;;  %v326_v11 = vld [vmem:[#allocation5 + $0x40] sm:$0xff]   ;;  %v327_v12 = vld [vmem:[#allocation5 + $0x48] sm:$0xff]   ;;  %s398_s22 = scalar_lea.vmem %s247_s21, 128  ;;  %p403_p11 = scmp.lt.s32.totalorder %s247_s21, %s247_s21 }
  0x3a   :  { %284 = vmatprep.subr.bf16.mxu0 %v431_v0  ;;  %292 = vmatprep.subr.bf16.mxu1 %v431_v0  ;;  %v256_v13 = vld [vmem:[#allocation7] ss:$0 sm:$0xff]  ;;  %v260_v22 = vld [vmem:[#allocation7 + $0x1] ss:$0 sm:$0xff]  ;;  %p399_p10 = scmp.ne.s32.totalorder %s247_s21, %s398_s22  ;;  %p404_p12 = scmp.lt.s32.totalorder %s398_s22, %s398_s22 }
  0x3c   :  { %p405_p13 = por %p404_p12, %p403_p11 }
  0x3d   :  { %285 = vmatpush3.bf16.msra.mxu0 %v319_v2  ;;  %293 = vmatpush3.bf16.msra.mxu1 %v321_v6 }
  0x3e   :  { %294 = vmatprep.subr.bf16.mxu1 %v431_v0  ;;  %p406_p0 = pnand %p405_p13, %p399_p10 }
  0x40   :  { %287 = vmatmul.mubr.msk.bf16.vlgmr.msra.gmra.mrb[0].mxu0 %vm93_vm1, %v54_v5 }
  0x41   :  { %295 = vmatpush3.bf16.msra.mxu1 %v322_v7 }
  0x42   :  { %296 = vmatprep.subr.bf16.mxu1 %v431_v0 }
  0x45   :  { %297 = vmatpush3.bf16.msra.mxu1 %v323_v8 }
  0x46   :  { %298 = vmatprep.subr.bf16.mxu1 %v431_v0 }
  0x49   :  { %299 = vmatpush3.bf16.msra.mxu1 %v324_v9 }
  0x4a   :  { %300 = vmatprep.subr.bf16.mxu1 %v431_v0 }
  0x4d   :  { %301 = vmatpush3.bf16.msra.mxu1 %v325_v10 }
  0x4e   :  { %302 = vmatprep.subr.bf16.mxu1 %v431_v0 }
  0x51   :  { %303 = vmatpush3.bf16.msra.mxu1 %v326_v11 }
  0x52   :  { %304 = vmatprep.subr.bf16.mxu1 %v431_v0 }
  0x55   :  { %305 = vmatpush3.bf16.msra.mxu1 %v327_v12 }
 0x113   :  { %v131_v14 = vpop.f32.mrb[0].mxu0 }
 0x114   :  { %v132_v15 = vadd.f32 %v256_v13, %v131_v14  ;;  %v288_v16 = vpop.f32.mrb[1].mxu0 }
 0x115   :  { %v134_v17 = vpop.f32.mrb[2].mxu0 }
 0x116   :  { %vm137_vm2 = vcmp.gt.f32.partialorder %v132_v15, 0.0  ;;  %v138_v18 = vmul.f32 0.2, %v132_v15  ;;  %v289_v19 = vpop.f32.mrb[3].mxu0 }
 0x118   :  { %v139_v20 = vsel %vm137_vm2, %v132_v15, %v138_v18 }
 0x119   :  { %v140_v21 = vpack.c.bf16 %v139_v20, %v139_v20 }
 0x11b   :  { %307 = vmatmul.mubr.bf16.vlgmr.msra.gmra.mrb[0].mxu1 %v140_v21 }
 0x1ee   :  { %v227_v23 = vpop.f32.mrb[0].mxu1 }
 0x1ef   :  { %v228_v24 = vadd.f32 %v260_v22, %v227_v23  ;;  %v308_v25 = vpop.f32.mrb[1].mxu1 }
 0x1f0   :  { %v230_v26 = vpop.f32.mrb[2].mxu1 }
 0x1f1   :  { %v269_v27 = vmul.f32 -1.442695, %v228_v24  ;;  %v309_v28 = vpop.f32.mrb[3].mxu1 }
 0x1f3   :  { %328 = vpow2.f32 %v269_v27 }
 0x1fd   :  { %v329_v29 = vpop.eup %328 }
 0x1fe   :  { %v236_v30 = vadd.f32 1.0, %v329_v29 }
 0x200   :  { %330 = vrcp.f32 %v236_v30 }
 0x20a   :  { %v331_v31 = vpop.eup %330 }
 0x20b   :  { %239 = vst [vmem:[#allocation8] sm:$0xff] %v331_v31 }
 0x20c   :  { %409 = shalt.err (!%p406_p0)
}
 0x20d   :  { %s410_s25 = scalar_lea.hbm %s505_s3, 128 }
 0x20e   :  { %p411_p1 = scmp.ne.s32.totalorder %s505_s3, %s410_s25  ;;  %p414_p2 = scmp.lt.u32.totalorder %s410_s25, %s505_s3 }
 0x210   :  { %p416_p3 = pnand %p414_p2, %p411_p1 }
 0x212   :  { %419 = shalt.err (!%p416_p3)
}
 0x213   :  { %249 = dma.vmem_to_hbm [thread:$0]  %s247_s21, 128, %s505_s3, [#allocation4]  }
 0x214   :  { %424 = dma.done.wait [#allocation4], 128  }
 0x215   :  { %425 = vsyncadd [#allocation4], 4294967168 }
 0x216   :  { %253 = vsyncpa [#allocation3], 1 }
 0x217   :  { %254 = vsyncpa [#allocation6], 1 }
 0x218   :  { %255 = vsyncpa [#allocation4], 1 }

</bundles_post_ra>
